<compile_context>
chip_gen: v5e
topology: v5e:2x2
jax: 0.10.0
libtpu: 0.0.40
codegen_flags: <defaults>
</compile_context>

<pallas_src>
import math
import functools

import jax
import jax.numpy as jnp
from jax import lax
from jax.experimental import pallas as pl
from jax.experimental.pallas import tpu as pltpu


def _round_up(x, m):
    return ((x + m - 1) // m) * m


def _linear_fa_kernel_bias(x_ref, w_ref, b_ref, o_ref, acc_ref):
    # x_ref: (tm, tk), w_ref: (tn, tk), b_ref: (1, tn), o_ref: (tm, tn)
    k = pl.program_id(2)

    @pl.when(k == 0)
    def _():
        acc_ref[...] = jnp.zeros_like(acc_ref)

    # Contract the shared K dim directly: (tm, tk) x (tn, tk) -> (tm, tn).
    acc_ref[...] += lax.dot_general(
        x_ref[...], w_ref[...],
        dimension_numbers=(((1,), (1,)), ((), ())),
        preferred_element_type=jnp.float32)

    @pl.when(k == pl.num_programs(2) - 1)
    def _():
        o_ref[...] = (acc_ref[...] + b_ref[...]).astype(o_ref.dtype)


def _linear_fa_kernel_nobias(x_ref, w_ref, o_ref, acc_ref):
    k = pl.program_id(2)

    @pl.when(k == 0)
    def _():
        acc_ref[...] = jnp.zeros_like(acc_ref)

    acc_ref[...] += lax.dot_general(
        x_ref[...], w_ref[...],
        dimension_numbers=(((1,), (1,)), ((), ())),
        preferred_element_type=jnp.float32)

    @pl.when(k == pl.num_programs(2) - 1)
    def _():
        o_ref[...] = acc_ref[...].astype(o_ref.dtype)


def linear_fa_forward(x, weight, weight_fa, bias=None, *,
                      tm=256, tn=256, tk=512,
                      vmem_limit_bytes=64 * 1024 * 1024):
    """Pallas implementation of LinearFAFunction.forward.

    x:         (B, in_features)
    weight:    (out_features, in_features)   -- torch.nn.Linear layout
    weight_fa: (out_features, in_features)   -- unused in forward
    bias:      (out_features,) or None
    Returns:   (B, out_features) = x @ weight.T (+ bias)
    """
    del weight_fa  # forward does not use the feedback-alignment matrix

    M, K = x.shape
    N, K_w = weight.shape
    assert K == K_w, "weight in_features mismatch"
    out_dtype = x.dtype
    weight = weight.astype(out_dtype)

    # Clamp tiles to the (alignment-padded) problem size.
    tm = max(8, min(tm, _round_up(M, 8)))
    tn = max(128, min(tn, _round_up(N, 128)))
    tk = max(128, min(tk, _round_up(K, 128)))

    M_pad = _round_up(M, tm)
    N_pad = _round_up(N, tn)
    K_pad = _round_up(K, tk)

    # Zero-pad so every block is (8,128)-aligned and the output is lane-dense.
    if (M_pad, K_pad) != (M, K):
        x = jnp.pad(x, ((0, M_pad - M), (0, K_pad - K)))
    if (N_pad, K_pad) != (N, K):
        weight = jnp.pad(weight, ((0, N_pad - N), (0, K_pad - K)))

    grid = (M_pad // tm, N_pad // tn, K_pad // tk)

    x_spec = pl.BlockSpec((tm, tk), lambda i, j, k: (i, k))
    w_spec = pl.BlockSpec((tn, tk), lambda i, j, k: (j, k))
    o_spec = pl.BlockSpec((tm, tn), lambda i, j, k: (i, j))

    compiler_params = pltpu.CompilerParams(
        dimension_semantics=("parallel", "parallel", "arbitrary"),
        vmem_limit_bytes=vmem_limit_bytes,
    )
    scratch_shapes = [pltpu.VMEM((tm, tn), jnp.float32)]
    out_shape = jax.ShapeDtypeStruct((M_pad, N_pad), out_dtype)

    if bias is not None:
        b2d = bias.astype(out_dtype).reshape(1, N)
        if N_pad != N:
            b2d = jnp.pad(b2d, ((0, 0), (0, N_pad - N)))
        b_spec = pl.BlockSpec((1, tn), lambda i, j, k: (0, j))
        out = pl.pallas_call(
            _linear_fa_kernel_bias,
            out_shape=out_shape,
            grid=grid,
            in_specs=[x_spec, w_spec, b_spec],
            out_specs=o_spec,
            scratch_shapes=scratch_shapes,
            compiler_params=compiler_params,
        )(x, weight, b2d)
    else:
        out = pl.pallas_call(
            _linear_fa_kernel_nobias,
            out_shape=out_shape,
            grid=grid,
            in_specs=[x_spec, w_spec],
            out_specs=o_spec,
            scratch_shapes=scratch_shapes,
            compiler_params=compiler_params,
        )(x, weight)

    if (M_pad, N_pad) != (M, N):
        out = out[:M, :N]
    return out


def make_linear_fa_params(key, input_features, output_features, use_bias=True,
                          dtype=jnp.float32):
    """Deterministic parameter init matching LinearFA.reset_parameters."""
    stdv = 1.0 / math.sqrt(input_features)
    k_w, k_fa, k_b = jax.random.split(key, 3)
    weight = jax.random.uniform(
        k_w, (output_features, input_features), dtype, minval=-stdv, maxval=stdv)
    weight_fa = jax.random.uniform(
        k_fa, (output_features, input_features), dtype, minval=-stdv, maxval=stdv)
    bias = jnp.zeros((output_features,), dtype) if use_bias else None
    # Give bias a non-zero value for a stronger numerical check.
    if use_bias:
        bias = jax.random.uniform(k_b, (output_features,), dtype,
                                  minval=-stdv, maxval=stdv)
    return weight, weight_fa, bias


if __name__ == "__main__":
    key = jax.random.PRNGKey(0)
    k_x, k_p, k_x2, k_p2 = jax.random.split(key, 4)

    # --- case 1: small shapes matching the module defaults, with bias ---
    batch, in_features, out_features = 8, 32, 16
    x = jax.random.normal(k_x, (batch, in_features), jnp.float32)
    weight, weight_fa, bias = make_linear_fa_params(
        k_p, in_features, out_features, use_bias=True)

    y = jax.block_until_ready(linear_fa_forward(x, weight, weight_fa, bias))
    y_ref = x @ weight.T + bias[None, :]
    assert y.shape == (batch, out_features)
    assert jnp.allclose(y, y_ref, atol=1e-5, rtol=1e-5)

    # --- case 2: forces a multi-step K reduction and the no-bias kernel ---
    batch2, in2, out2 = 8, 320, 200
    x2 = jax.random.normal(k_x2, (batch2, in2), jnp.float32)
    w2, w2_fa, _ = make_linear_fa_params(k_p2, in2, out2, use_bias=False)

    y2 = jax.block_until_ready(
        linear_fa_forward(x2, w2, w2_fa, None, tm=8, tn=128, tk=128))
    y2_ref = x2 @ w2.T
    assert y2.shape == (batch2, out2)
    assert jnp.allclose(y2, y2_ref, atol=1e-4, rtol=1e-4)

    print("KERNEL_OK")
</pallas_src>

<mosaic_0001>
module attributes {stable_mosaic.version = 11 : i64} {
  func.func @_linear_fa_kernel_bias(%arg0: i32, %arg1: i32, %arg2: i32, %arg3: memref<8x128xf32, #tpu.memory_space<vmem>>, %arg4: memref<128x128xf32, #tpu.memory_space<vmem>>, %arg5: memref<1x128xf32, #tpu.memory_space<vmem>>, %arg6: memref<8x128xf32, #tpu.memory_space<vmem>>, %arg7: memref<8x128xf32, #tpu.memory_space<vmem>>) attributes {dimension_semantics = [#tpu.dimension_semantics<parallel>, #tpu.dimension_semantics<parallel>, #tpu.dimension_semantics<arbitrary>], iteration_bounds = array<i64: 1, 1, 1>, scalar_prefetch = 0 : i64, scratch_operands = 1 : i64, tpu.core_type = #tpu.core_type<tc>, window_params = [{transform_indices = @transform_0, window_bounds = array<i64: 8, 128>}, {transform_indices = @transform_1, window_bounds = array<i64: 128, 128>}, {transform_indices = @transform_2, window_bounds = array<i64: 1, 128>}, {transform_indices = @transform_3, window_bounds = array<i64: 8, 128>}]} {
    %c0_i32 = arith.constant 0 : i32
    %0 = arith.cmpi eq, %arg2, %c0_i32 : i32
    %1 = arith.extui %0 : i1 to i32
    %c0_i32_0 = arith.constant 0 : i32
    %2 = arith.cmpi ne, %1, %c0_i32_0 : i32
    scf.if %2 {
      %cst_10 = arith.constant 0.000000e+00 : f32
      %12 = vector.broadcast %cst_10 : f32 to vector<8x128xf32>
      %c0_11 = arith.constant 0 : index
      %c0_12 = arith.constant 0 : index
      %13 = vector.load %arg7[%c0_11, %c0_12] : memref<8x128xf32, #tpu.memory_space<vmem>>, vector<8x128xf32>
      tpu.vector_store %arg7[%c0_11, %c0_12], %12 {strides = array<i32>} : memref<8x128xf32, #tpu.memory_space<vmem>>, vector<8x128xf32>,
    } else {
    }
    %c0 = arith.constant 0 : index
    %c0_1 = arith.constant 0 : index
    %3 = vector.load %arg7[%c0, %c0_1] : memref<8x128xf32, #tpu.memory_space<vmem>>, vector<8x128xf32>
    %c0_2 = arith.constant 0 : index
    %c0_3 = arith.constant 0 : index
    %4 = vector.load %arg3[%c0_2, %c0_3] : memref<8x128xf32, #tpu.memory_space<vmem>>, vector<8x128xf32>
    %c0_4 = arith.constant 0 : index
    %c0_5 = arith.constant 0 : index
    %5 = vector.load %arg4[%c0_4, %c0_5] : memref<128x128xf32, #tpu.memory_space<vmem>>, vector<128x128xf32>
    %cst = arith.constant dense<0.000000e+00> : vector<8x128xf32>
    %6 = tpu.matmul %4, %5, %cst {dimension_numbers = #tpu.dot_dimension_numbers<[1], [1], [0], [0], [0, 0, 1, 0], [], []>} : vector<8x128xf32>, vector<128x128xf32>, vector<8x128xf32> -> vector<8x128xf32>
    %7 = arith.addf %3, %6 : vector<8x128xf32>
    %c0_6 = arith.constant 0 : index
    %c0_7 = arith.constant 0 : index
    %8 = vector.load %arg7[%c0_6, %c0_7] : memref<8x128xf32, #tpu.memory_space<vmem>>, vector<8x128xf32>
    tpu.vector_store %arg7[%c0_6, %c0_7], %7 {strides = array<i32>} : memref<8x128xf32, #tpu.memory_space<vmem>>, vector<8x128xf32>,
    %c0_i32_8 = arith.constant 0 : i32
    %9 = arith.cmpi eq, %arg2, %c0_i32_8 : i32
    %10 = arith.extui %9 : i1 to i32
    %c0_i32_9 = arith.constant 0 : i32
    %11 = arith.cmpi ne, %10, %c0_i32_9 : i32
    scf.if %11 {
      %c0_10 = arith.constant 0 : index
      %c0_11 = arith.constant 0 : index
      %12 = vector.load %arg7[%c0_10, %c0_11] : memref<8x128xf32, #tpu.memory_space<vmem>>, vector<8x128xf32>
      %c0_12 = arith.constant 0 : index
      %c0_13 = arith.constant 0 : index
      %13 = vector.load %arg5[%c0_12, %c0_13] : memref<1x128xf32, #tpu.memory_space<vmem>>, vector<1x128xf32>
      %14 = vector.broadcast %13 : vector<1x128xf32> to vector<8x128xf32>
      %15 = arith.addf %12, %14 : vector<8x128xf32>
      %c0_14 = arith.constant 0 : index
      %c0_15 = arith.constant 0 : index
      %16 = vector.load %arg6[%c0_14, %c0_15] : memref<8x128xf32, #tpu.memory_space<vmem>>, vector<8x128xf32>
      tpu.vector_store %arg6[%c0_14, %c0_15], %15 {strides = array<i32>} : memref<8x128xf32, #tpu.memory_space<vmem>>, vector<8x128xf32>,
    } else {
    }
    return
  }
  func.func @transform_0(%arg0: i32, %arg1: i32, %arg2: i32) -> (i32, i32) {
    %c0_i32 = arith.constant 0 : i32
    return %arg0, %arg2 : i32, i32
  }
  func.func @transform_1(%arg0: i32, %arg1: i32, %arg2: i32) -> (i32, i32) {
    %c0_i32 = arith.constant 0 : i32
    return %arg1, %arg2 : i32, i32
  }
  func.func @transform_2(%arg0: i32, %arg1: i32, %arg2: i32) -> (i32, i32) {
    %c0_i32 = arith.constant 0 : i32
    %c0_i32_0 = arith.constant 0 : i32
    return %c0_i32, %arg1 : i32, i32
  }
  func.func @transform_3(%arg0: i32, %arg1: i32, %arg2: i32) -> (i32, i32) {
    %c0_i32 = arith.constant 0 : i32
    return %arg0, %arg1 : i32, i32
  }
}

</mosaic_0001>

<bundles_post_ra>
// kernel: tpu_custom_call.1
= control target key start
LH: loop header
LB: loop body
LE: loop exit
PB: predicated region body
PF: predicated region fallthrough
CT: control target
= control target key end

     0   :  { %8 = vsyncpa [#allocation4], 0  ;;  %s239_s0 = inlined_call_operand.hbm [shape: f32[8,128], index: 0, kind: input, shape index: {}]   ;;  %s240_s1 = inlined_call_operand.hbm [shape: f32[128,128], index: 1, kind: input, shape index: {}]   ;;  %s241_s2 = inlined_call_operand.vmem [shape: f32[1,128], index: 2, kind: input, shape index: {}]   ;;  %s242_s3 = inlined_call_operand.hbm [shape: f32[8,128], index: 3, kind: output, shape index: {}]  }
   0x1   :  { %9 = vsyncpa [#allocation7], 0 }
   0x2   :  { %10 = vsyncpa [#allocation5], 0  ;;  %s16_s14 = sshll.u32 %s239_s0, 4  ;;  %s202_s15 = smov [#allocation3]   ;;  %s17_s14 = int_to_ptr.hbm [resolvable:$true] %s16_s14 }
   0x3   :  { %s18_s16 = sshll.u32 %s202_s15, 4  ;;  %s26_s19 = sshll.u32 %s240_s1, 4  ;;  %s19_s16 = int_to_ptr.vmem [resolvable:$true] %s18_s16  ;;  %s27_s19 = int_to_ptr.hbm [resolvable:$true] %s26_s19 }
   0x4   :  { %21 = dma.hbm_to_vmem [thread:$0]  %s17_s14, 128, %s19_s16, [#allocation4]  }
   0x5   :  { %s203_s20 = smov [#allocation6]   ;;  %s204_s22 = smov 128  }
   0x6   :  { %s28_s21 = sshll.u32 %s203_s20, 4  ;;  %s205_s23 = smov 8   ;;  %s29_s21 = int_to_ptr.vmem [resolvable:$true] %s28_s21 }
   0x7   :  { %34 = dma.hbm_to_vmem [thread:$0]  %s27_s19, 2048, %s29_s21, [#allocation7], %s204_s22, %s204_s22, %s205_s23  }
   0x8   :  { %196 = dma.done.wait [#allocation4], 128  }
   0x9   :  { %197 = vsyncadd [#allocation4], 4294967168 }
   0xa   :  { %198 = dma.done.wait [#allocation7], 2048  }
   0xb   :  { %199 = vsyncadd [#allocation7], 4294965248  ;;  %v67_v0 = vld [vmem:[#allocation6 + $0x78] sm:$0xff]  ;;  %v66_v1 = vld [vmem:[#allocation6 + $0x70] sm:$0xff]  ;;  %s206_s24 = smov [#allocation8]   ;;  %s107_s28 = sshll.u32 %s242_s3, 4  ;;  %s108_s28 = int_to_ptr.hbm [resolvable:$true] %s107_s28 }
   0xc   :  { %68 = vmatpush.xpose.msra.mxu0 %v67_v0  ;;  %v65_v2 = vld [vmem:[#allocation6 + $0x68] sm:$0xff]  ;;  %v64_v3 = vld [vmem:[#allocation6 + $0x60] sm:$0xff]  ;;  %v63_v4 = vld [vmem:[#allocation6 + $0x58] sm:$0xff]  ;;  %s105_s25 = sshll.u32 %s206_s24, 4  ;;  %s106_s25 = int_to_ptr.vmem [resolvable:$true] %s105_s25 }
   0xd   :  { %v62_v5 = vld [vmem:[#allocation6 + $0x50] sm:$0xff]  ;;  %v61_v6 = vld [vmem:[#allocation6 + $0x48] sm:$0xff]  ;;  %v60_v7 = vld [vmem:[#allocation6 + $0x40] sm:$0xff] }
   0xe   :  { %v59_v8 = vld [vmem:[#allocation6 + $0x38] sm:$0xff]  ;;  %v58_v9 = vld [vmem:[#allocation6 + $0x30] sm:$0xff]  ;;  %v57_v10 = vld [vmem:[#allocation6 + $0x28] sm:$0xff] }
   0xf   :  { %v56_v11 = vld [vmem:[#allocation6 + $0x20] sm:$0xff]  ;;  %v55_v12 = vld [vmem:[#allocation6 + $0x18] sm:$0xff]  ;;  %v54_v13 = vld [vmem:[#allocation6 + $0x10] sm:$0xff] }
  0x10   :  { %69 = vmatpush.xpose.msra.mxu0 %v66_v1  ;;  %v53_v14 = vld [vmem:[#allocation6 + $0x8] sm:$0xff]  ;;  %v52_v15 = vld [vmem:[#allocation6] sm:$0xff]  ;;  %v51_v16 = vld [vmem:[#allocation3] sm:$0xff] }
  0x11   :  { %v123_v17 = vld [vmem:[%s241_s2] ss:$0 sm:$0xff] }
  0x14   :  { %70 = vmatpush.xpose.msra.mxu0 %v65_v2 }
  0x18   :  { %71 = vmatpush.xpose.msra.mxu0 %v64_v3 }
  0x1c   :  { %72 = vmatpush.xpose.msra.mxu0 %v63_v4 }
  0x20   :  { %73 = vmatpush.xpose.msra.mxu0 %v62_v5 }
  0x24   :  { %74 = vmatpush.xpose.msra.mxu0 %v61_v6 }
  0x28   :  { %75 = vmatpush.xpose.msra.mxu0 %v60_v7 }
  0x2c   :  { %76 = vmatpush.xpose.msra.mxu0 %v59_v8 }
  0x30   :  { %77 = vmatpush.xpose.msra.mxu0 %v58_v9 }
  0x34   :  { %78 = vmatpush.xpose.msra.mxu0 %v57_v10 }
  0x38   :  { %79 = vmatpush.xpose.msra.mxu0 %v56_v11 }
  0x3c   :  { %80 = vmatpush.xpose.msra.mxu0 %v55_v12 }
  0x40   :  { %81 = vmatpush.xpose.msra.mxu0 %v54_v13 }
  0x44   :  { %82 = vmatpush.xpose.msra.mxu0 %v53_v14 }
  0x48   :  { %83 = vmatpush.xpose.msra.mxu0 %v52_v15 }
  0x4b   :  { %84 = vmatmul.f32.vlgmr.msra.gmra.mxu0 %v51_v16 }
  0xc8   :  { %v85_v18 = vpop.f32.mrf.mxu0 }
  0xc9   :  { %v98_v19 = vadd.f32 %v123_v17, %v85_v18 }
  0xcb   :  { %99 = vst [vmem:[#allocation8] sm:$0xff] %v98_v19 }
  0xcc   :  { %110 = dma.vmem_to_hbm [thread:$0]  %s106_s25, 128, %s108_s28, [#allocation5]  }
  0xcd   :  { %200 = dma.done.wait [#allocation5], 128  }
  0xce   :  { %201 = vsyncadd [#allocation5], 4294967168 }
  0xcf   :  { %115 = vsyncpa [#allocation4], 1 }
  0xd0   :  { %116 = vsyncpa [#allocation7], 1 }
  0xd1   :  { %117 = vsyncpa [#allocation5], 1 }

</bundles_post_ra>
